<compile_context>
chip_gen: v7x
topology: tpu7x:2x2x1
jax: 0.10.0
libtpu: 0.0.40
codegen_flags: <defaults>
</compile_context>

<pallas_src>
import jax
import jax.numpy as jnp
from jax import lax
from jax.experimental import pallas as pl
from jax.experimental.pallas import tpu as pltpu


def _round_up(v, m):
    return ((v + m - 1) // m) * m


def _head_kernel(x_ref, w_ref, b_ref, o_ref):
    # x_ref: (TM, D)      streamed token tile
    # w_ref: (n_cls, D)   resident Linear weight (PyTorch layout, untransposed)
    # b_ref: (n_cls, 1)   resident bias
    # o_ref: (n_cls, TM)  lane-dense "permuted" output tile
    acc = lax.dot_general(
        w_ref[...], x_ref[...],
        dimension_numbers=(((1,), (1,)), ((), ())),   # contract over D
        preferred_element_type=jnp.float32,
    )                                                  # (n_cls, TM) f32
    o_ref[...] = (acc + b_ref[...].astype(jnp.float32)).astype(o_ref.dtype)


def decoder_linear_forward(x, weight, bias, im_size, patch_size, *, tm=1024):
    """Pallas implementation of DecoderLinear.forward.

    x:      (B, N, d_encoder)   token embeddings
    weight: (n_cls, d_encoder)  nn.Linear weight (PyTorch layout)
    bias:   (n_cls,)            nn.Linear bias
    returns (1, n_cls, GS, B*N // GS)  -- matches torch reshape(1, n_cls, GS, -1)
    """
    H, W = im_size
    GS = H // patch_size
    B, N, D = x.shape
    n_cls = weight.shape[0]

    # Token-tile size: multiple of 128 (lane-dense output blocks).
    TM = min(tm, _round_up(N, 128))
    # Ensure >= 2 token tiles when B == 1 so both v7x TensorCores get grid work
    # (costs ~1% HBM-roofline on v5e/v6e, harmless).
    if B == 1 and N > 128:
        TM = min(TM, max(128, _round_up(pl.cdiv(N, 2), 128)))

    n_tiles = pl.cdiv(N, TM)
    grid = (B, n_tiles)

    b2d = bias.reshape(n_cls, 1)        # (n_cls, 1) so acc + bias broadcasts on lanes

    # Size the scoped VMEM limit from the actual (sublane-padded) footprint with
    # headroom, capped at half the chip's VMEM capacity (v7x has only 64 MiB).
    itemsize = jnp.dtype(x.dtype).itemsize
    c_pad = _round_up(n_cls, 8)
    vmem_need = (
        2 * TM * D * itemsize                         # double-buffered x tiles
        + 2 * c_pad * TM * itemsize                   # double-buffered output tiles
        + 2 * c_pad * _round_up(D, 128) * itemsize    # resident weight buffers
        + 2 * c_pad * 128 * itemsize                  # resident bias buffers
        + c_pad * TM * 4                              # f32 accumulator vregs
    )
    try:
        vmem_cap = int(pltpu.get_tpu_info().vmem_capacity_bytes)
    except Exception:
        vmem_cap = 64 << 20                           # conservative (v7x) fallback
    vmem_limit = int(min(max(2 * vmem_need, 8 << 20), vmem_cap // 2))

    out = pl.pallas_call(
        _head_kernel,
        out_shape=jax.ShapeDtypeStruct((B, n_cls, N), x.dtype),
        grid=grid,
        in_specs=[
            pl.BlockSpec((None, TM, D), lambda b, t: (b, t, 0)),     # x (streamed)
            pl.BlockSpec((n_cls, D), lambda b, t: (0, 0)),           # weight (resident)
            pl.BlockSpec((n_cls, 1), lambda b, t: (0, 0)),           # bias (resident)
        ],
        out_specs=pl.BlockSpec((None, n_cls, TM), lambda b, t: (b, 0, t)),
        compiler_params=pltpu.CompilerParams(
            dimension_semantics=("parallel", "parallel"),
            vmem_limit_bytes=vmem_limit,
        ),
    )(x, weight, b2d)

    # Kernel output is already the permuted (B, n_cls, N) layout; the final
    # reshape is a zero-cost metadata op matching torch's reshape(1, n_cls, GS, -1).
    return out.reshape(1, n_cls, GS, -1)


def _reference(x, weight, bias, im_size, patch_size):
    H, W = im_size
    GS = H // patch_size
    n_cls = weight.shape[0]
    y = jnp.einsum("bnd,cd->bnc", x.astype(jnp.float32),
                   weight.astype(jnp.float32)) + bias.astype(jnp.float32)
    y = jnp.transpose(y, (0, 2, 1))
    return y.reshape(1, n_cls, GS, -1)


def _run_case(key, n_cls, d_encoder, H, W, patch_size, dtype, atol):
    GS = H // patch_size
    N = GS * GS
    B = 1   # forward hardcodes reshape(1, ...)

    kx, kw = jax.random.split(key)
    x = jax.random.normal(kx, (B, N, d_encoder), dtype=jnp.float32).astype(dtype)
    weight = (0.02 * jax.random.normal(kw, (n_cls, d_encoder),
                                       dtype=jnp.float32)).astype(dtype)
    bias = (0.1 * jnp.arange(n_cls, dtype=jnp.float32)).astype(dtype)

    out = decoder_linear_forward(x, weight, bias, (H, W), patch_size)
    out = jax.block_until_ready(out)

    ref = _reference(x, weight, bias, (H, W), patch_size)
    assert out.shape == ref.shape == (1, n_cls, GS, (B * N) // GS), out.shape
    err = float(jnp.max(jnp.abs(out.astype(jnp.float32) - ref)))
    assert err < atol, (dtype, err)


if __name__ == "__main__":
    key = jax.random.PRNGKey(0)
    k1, k2, k3 = jax.random.split(key, 3)

    # 1) f32, exact-fit tiles: 128x128 image, patch 8 -> GS=16, N=256 (grid 1x2).
    _run_case(k1, n_cls=2, d_encoder=128, H=128, W=128, patch_size=8,
              dtype=jnp.float32, atol=1e-4)

    # 2) f32, ragged N exercising boundary masking (no jnp.pad):
    #    192x192 image, patch 8 -> GS=24, N=576, TM=384 (last tile half-masked).
    _run_case(k2, n_cls=2, d_encoder=128, H=192, W=192, patch_size=8,
              dtype=jnp.float32, atol=1e-4)

    # 3) bf16 streaming path (halves HBM read of x), f32 MXU accumulate.
    _run_case(k3, n_cls=2, d_encoder=128, H=192, W=192, patch_size=8,
              dtype=jnp.bfloat16, atol=2e-2)

    print("KERNEL_OK")
</pallas_src>

<mosaic_0001>
module attributes {stable_mosaic.version = 11 : i64} {
  func.func @_head_kernel(%arg0: i32, %arg1: i32, %arg2: memref<1x128x128xf32, #tpu.memory_space<vmem>>, %arg3: memref<2x128xf32, #tpu.memory_space<vmem>>, %arg4: memref<2x1xf32, #tpu.memory_space<vmem>>, %arg5: memref<1x2x128xf32, #tpu.memory_space<vmem>>) attributes {dimension_semantics = [#tpu.dimension_semantics<parallel>, #tpu.dimension_semantics<parallel>], iteration_bounds = array<i64: 1, 2>, scalar_prefetch = 0 : i64, scratch_operands = 0 : i64, tpu.core_type = #tpu.core_type<tc>, window_params = [{transform_indices = @transform_0, window_bounds = array<i64: 1, 128, 128>}, {pipeline_mode = #tpu.pipeline_mode<synchronous>, transform_indices = @transform_1, window_bounds = array<i64: 2, 128>}, {pipeline_mode = #tpu.pipeline_mode<synchronous>, transform_indices = @transform_2, window_bounds = array<i64: 2, 1>}, {transform_indices = @transform_3, window_bounds = array<i64: 1, 2, 128>}]} {
    %c0 = arith.constant 0 : index
    %c0_0 = arith.constant 0 : index
    %0 = vector.load %arg3[%c0, %c0_0] : memref<2x128xf32, #tpu.memory_space<vmem>>, vector<2x128xf32>
    %c0_1 = arith.constant 0 : index
    %c0_2 = arith.constant 0 : index
    %c0_3 = arith.constant 0 : index
    %1 = vector.load %arg2[%c0_1, %c0_2, %c0_3] : memref<1x128x128xf32, #tpu.memory_space<vmem>>, vector<1x128x128xf32>
    %2 = vector.shape_cast %1 : vector<1x128x128xf32> to vector<128x128xf32>
    %cst = arith.constant dense<0.000000e+00> : vector<2x128xf32>
    %3 = tpu.matmul %0, %2, %cst {dimension_numbers = #tpu.dot_dimension_numbers<[1], [1], [0], [0], [0, 0, 1, 0], [], []>} : vector<2x128xf32>, vector<128x128xf32>, vector<2x128xf32> -> vector<2x128xf32>
    %c0_4 = arith.constant 0 : index
    %c0_5 = arith.constant 0 : index
    %4 = vector.load %arg4[%c0_4, %c0_5] : memref<2x1xf32, #tpu.memory_space<vmem>>, vector<2x1xf32>
    %5 = vector.broadcast %4 : vector<2x1xf32> to vector<2x128xf32>
    %6 = arith.addf %3, %5 : vector<2x128xf32>
    %c0_6 = arith.constant 0 : index
    %c0_7 = arith.constant 0 : index
    %c0_8 = arith.constant 0 : index
    %7 = vector.load %arg5[%c0_6, %c0_7, %c0_8] : memref<1x2x128xf32, #tpu.memory_space<vmem>>, vector<1x2x128xf32>
    %8 = vector.shape_cast %7 : vector<1x2x128xf32> to vector<2x128xf32>
    %9 = vector.shape_cast %6 : vector<2x128xf32> to vector<1x2x128xf32>
    tpu.vector_store %arg5[%c0_6, %c0_7, %c0_8], %9 {strides = array<i32>} : memref<1x2x128xf32, #tpu.memory_space<vmem>>, vector<1x2x128xf32>,
    return
  }
  func.func @transform_0(%arg0: i32, %arg1: i32) -> (i32, i32, i32) {
    %c0_i32 = arith.constant 0 : i32
    %c0_i32_0 = arith.constant 0 : i32
    return %arg0, %arg1, %c0_i32 : i32, i32, i32
  }
  func.func @transform_1(%arg0: i32, %arg1: i32) -> (i32, i32) {
    %c0_i32 = arith.constant 0 : i32
    %c0_i32_0 = arith.constant 0 : i32
    %c0_i32_1 = arith.constant 0 : i32
    return %c0_i32, %c0_i32_0 : i32, i32
  }
  func.func @transform_2(%arg0: i32, %arg1: i32) -> (i32, i32) {
    %c0_i32 = arith.constant 0 : i32
    %c0_i32_0 = arith.constant 0 : i32
    %c0_i32_1 = arith.constant 0 : i32
    return %c0_i32, %c0_i32_0 : i32, i32
  }
  func.func @transform_3(%arg0: i32, %arg1: i32) -> (i32, i32, i32) {
    %c0_i32 = arith.constant 0 : i32
    %c0_i32_0 = arith.constant 0 : i32
    return %arg0, %c0_i32, %arg1 : i32, i32, i32
  }
}

</mosaic_0001>

<bundles_post_ra>
// kernel: tpu_custom_call.1
= control target key start
LH: loop header
LB: loop body
LE: loop exit
PB: predicated region body
PF: predicated region fallthrough
CT: control target
= control target key end

     0   :  { %8 = vsyncpa [#allocation3], 0  ;;  %s901_s0 = inlined_call_operand.hbm [shape: f32[1,256,128], index: 0, kind: input, shape index: {}]   ;;  %s902_s1 = inlined_call_operand.vmem [shape: f32[2,128], index: 1, kind: input, shape index: {}]   ;;  %s903_s2 = inlined_call_operand.vmem [shape: f32[2,1], index: 2, kind: input, shape index: {}]   ;;  %s904_s3 = inlined_call_operand.hbm [shape: f32[1,2,256], index: 3, kind: output, shape index: {}]  }
   0x1   :  { %10 = vsyncpa [#allocation3 + $0x1], 0 }
   0x2   :  { %11 = vsyncpa [#allocation4], 0 }
   0x3   :  { %13 = vsyncpa [#allocation4 + $0x1], 0  ;;  %s703_s12 = smov 0   ;;  %s705_s13 = smov 0  }
   0x4   :  { %s707_s14 = smov 0   ;;  %s709_s15 = smov 0  }
   0x5   :  { %s711_s16 = smov 0   ;;  %s713_s17 = smov 0  }
   0x6 LB: > { %s401_s18 = sadd.s32 4294967295, %s673_s17   ;;  %s402_s19 = sadd.s32 4294967294, %s673_s17   ;;  %s673_s17 = sphi %s713_s17, %s19_s17   ;;  %s669_s16 = sphi %s711_s16, %s919_s16   ;;  %s665_s15 = sphi %s709_s15, %s918_s15   ;;  %s661_s14 = sphi %s707_s14, %s917_s14   ;;  %s657_s13 = sphi %s705_s13, %s916_s13   ;;  %s653_s12 = sphi %s703_s12, %s915_s12  }
   0x7   : > { %s28_s20 = sadd.s32 1, %s669_s16  ;;  %s40_s21 = sadd.s32 1, %s661_s14 }
   0x8   : > { %p29_p0 = scmp.ge.s32.totalorder %s28_s20, 2  ;;  %p47_p1 = scmp.ne.s32.totalorder %s661_s14, %s657_s13 }
   0x9   : > { %p48_p2 = scmp.eq.s32.totalorder %s673_s17, 0  ;;  %p53_p3 = scmp.ne.s32.totalorder %s657_s13, %s653_s12 }
   0xa   : > { %s921_s20 = smov (%p29_p0, %s28_s20), 0  ;;  %p54_p5 = scmp.eq.s32.totalorder %s401_s18, 0 }
   0xb   : > { %p744_p4 = por %p48_p2, %p47_p1  ;;  %s36_s23 = ssub.s32 %s669_s16, %s921_s20 }
   0xc   : > { %p121_p6 = scmp.eq.s32.totalorder %s401_s18, 1  ;;  %p38_p7 = scmp.eq.s32.totalorder %s36_s23, 0 }
   0xd   : > { %p750_p8 = por %p54_p5, %p53_p3  ;;  %p127_p10 = scmp.eq.s32.totalorder %s402_s19, 1 }
   0xe   : > { %p754_p9 = por %p121_p6, %p47_p1  ;;  %p504_p13 = scmp.lt.s32.totalorder %s673_s17, 2 }
   0xf   : > { %s759_s26 = scalar_select %p38_p7, %s661_s14, %s40_s21  }
  0x10   : > { %s908_s25 = scalar_select %p754_p9, 1, 0 }
  0x11   : > { %p761_p11 = por %p127_p10, %p53_p3  ;;  %s153_s28 = sand.u32 1, %s661_s14  }
  0x12   : > { %s405_s29 = sshll.u32 %s153_s28, 7  ;;  %s415_s30 = sshll.u32 %s669_s16, 11 }
  0x13   : > { %s909_s27 = scalar_select %p761_p11, 1, 0 }
  0x14   : > { %s772_s6 = scalar_lea.hbm %s901_s0, %s415_s30  ;;  %s157_s7 = scalar_lea.vmem [#allocation2], %s405_s29 }
  0x15   : > { %s166_s8 = sshll.u32 %s157_s7, 4  ;;  %p778_p0 = pnand %p504_p13, %p744_p4  ;;  %s774_s8 = int_to_ptr.vmem [resolvable:$true] %s166_s8 }
  0x16   : > { %s783_s10 = scalar_lea.sflag [#allocation3], %s153_s28  ;;  %s561_s11 = scalar_lea.hbm %s772_s6, 2048 }
  0x17   : > { %p562_p2 = scmp.ne.s32.totalorder %s772_s6, %s561_s11  ;;  %p563_p3 = pneg %p778_p0 }
  0x18   : > { %s566_s21 = scalar_lea.hbm %s901_s0, 4096  ;;  %p567_p4 = scmp.lt.u32.totalorder %s772_s6, %s901_s0 }
  0x19   : > { %p564_p5 = pnand %p563_p3, %p562_p2  ;;  %p568_p7 = scmp.lt.u32.totalorder %s566_s21, %s561_s11 }
  0x1a   : > { %p570_p13 = scmp.lt.u32.totalorder %s561_s11, %s772_s6 }
  0x1b   : > { %p565_p6 = pneg %p564_p5  ;;  %p569_p10 = por %p568_p7, %p567_p4 }
  0x1d   : > { %p571_p12 = por %p570_p13, %p569_p10 }
  0x1f   : > { %p572_p1 = pnand %p571_p12, %p565_p6 }
  0x21   : > { %575 = shalt.err (!%p572_p1)
}
  0x22   : > { %s576_s28 = scalar_lea.vmem %s774_s8, 2048  ;;  %s675_s29 = smov [#allocation2]  }
  0x23   : > { %p577_p2 = scmp.ne.s32.totalorder %s774_s8, %s576_s28  ;;  %s581_s30 = sshll.u32 %s675_s29, 4  ;;  %s582_s30 = int_to_ptr.vmem [resolvable:$false] %s581_s30 }
  0x24   : > { %s583_s4 = scalar_lea.vmem %s582_s30, 4096  ;;  %p584_p9 = scmp.lt.s32.totalorder %s774_s8, %s582_s30 }
  0x25   : > { %p579_p5 = pnand %p577_p2, %p563_p3  ;;  %p585_p4 = scmp.lt.s32.totalorder %s583_s4, %s576_s28 }
  0x27   : > { %p580_p11 = pneg %p579_p5  ;;  %p586_p7 = por %p585_p4, %p584_p9 }
  0x29   : > { %p587_p10 = pnand %p586_p7, %p580_p11 }
  0x2b   : > { %590 = shalt.err (!%p587_p10)
}
  0x2c   : > { %s676_s5 = smov 128   ;;  %s677_s7 = smov 8  }
  0x2d   : > { %499 = dma.hbm_to_vmem [thread:$0]  (!%p778_p0), %s772_s6, 2048, %s774_s8, %s783_s10, %s676_s5, %s676_s5, %s677_s7  }
  0x2e   : > { %p174_p12 = scmp.lt.s32.totalorder %s673_s17, 3  ;;  %p911_p1 = scmp.ge.s32.totalorder %s673_s17, 1 }
  0x30   : > { %p175_p3 = pnand %p911_p1, %p174_p12 }
  0x31   : > { %s815_s11 = sand.u32 (!%p175_p3), 1, %s657_s13  }
  0x32   : > { %178 = sbr.rel (%p175_p3) target bundleno = 353 (0x161), region = 32  ;;  %s409_s18 = sshll.u32 (!%p175_p3), %s815_s11, 7 }
  0x33   : > { %s181_s19 = scalar_lea.sflag (!%p175_p3), [#allocation3], %s815_s11  ;;  %s819_s21 = scalar_lea.vmem (!%p175_p3), [#allocation2], %s409_s18 }
  0x39   : > { %644 = dma.done.wait (%p750_p8), %s181_s19, 2048  }
  0x3a   : > { %646 = vsyncadd (%p750_p8), %s181_s19, 4294965248  ;;  %v678_v0 = vmov 0.0|0.0   ;;  %vm679_vm0 = vmmov 0   ;;  %v680_v1 = vmov 0.0   ;;  %v681_v2 = vmov 0   ;;  %v209_v3 = vld [vmem:[%s819_s21] sm:$0xff] }
  0x3b   : > { %468 = vmatprep.subr.bf16.mxu0 %v678_v0  ;;  %465 = vmatprep.mubr.msk.f32.mxu0 %vm679_vm0, %v680_v1  ;;  %v210_v4 = vld [vmem:[%s819_s21 + $0x8] sm:$0xff]  ;;  %v211_v6 = vld [vmem:[%s819_s21 + $0x10] sm:$0xff]  ;;  %v212_v7 = vld [vmem:[%s819_s21 + $0x18] sm:$0xff]  ;;  %s410_s10 = sshll.u32 %s815_s11, 1  ;;  %s412_s22 = sshll.u32 %s665_s15, 5 }
  0x3c   : > { %560 = vset.pattern.permute.xlu0 %v681_v2  ;;  %v469_v5 = vpack.c.bf16 %v210_v4, %v209_v3  ;;  %v225_v8 = vld [vmem:[%s903_s2] sm:$0x3]  ;;  %v472_v9 = vpack.c.bf16 %v212_v7, %v211_v6  ;;  %v214_v11 = vld [vmem:[%s819_s21 + $0x28] sm:$0xff]  ;;  %v215_v13 = vld [vmem:[%s819_s21 + $0x30] sm:$0xff]  ;;  %s206_s23 = scalar_lea.vmem [#allocation5], %s410_s10  ;;  %s852_s4 = scalar_lea.hbm %s904_s3, %s412_s22 }
  0x3d   : > { %228 = vperm.xlu0 %560, %v225_v8   ;;  %v213_v10 = vld [vmem:[%s819_s21 + $0x20] sm:$0xff]  ;;  %v216_v14 = vld [vmem:[%s819_s21 + $0x38] sm:$0xff]  ;;  %v218_v17 = vld [vmem:[%s819_s21 + $0x48] sm:$0xff]  ;;  %s318_s28 = sshll.u32 %s206_s23, 4  ;;  %s303_s5 = scalar_lea.sflag [#allocation4], %s815_s11  ;;  %s854_s28 = int_to_ptr.vmem [resolvable:$true] %s318_s28 }
  0x3e   : > { %470 = vmatpush3.bf16.xpose.msra.mxu0 %v469_v5  ;;  %v475_v12 = vpack.c.bf16 %v214_v11, %v213_v10  ;;  %v478_v15 = vpack.c.bf16 %v216_v14, %v215_v13  ;;  %v217_v16 = vld [vmem:[%s819_s21 + $0x40] sm:$0xff]  ;;  %v219_v19 = vld [vmem:[%s819_s21 + $0x50] sm:$0xff]  ;;  %v220_v20 = vld [vmem:[%s819_s21 + $0x58] sm:$0xff]  ;;  %s591_s7 = scalar_lea.vmem %s854_s28, 32  ;;  %p912_p9 = scmp.ne.s32.totalorder %s908_s25, 0 }
  0x3f   : > { %471 = vmatprep.subr.bf16.mxu0 %v678_v0  ;;  %v481_v18 = vpack.c.bf16 %v218_v17, %v217_v16  ;;  %v484_v21 = vpack.c.bf16 %v220_v20, %v219_v19  ;;  %v221_v22 = vld [vmem:[%s819_s21 + $0x60] sm:$0xff]  ;;  %v222_v23 = vld [vmem:[%s819_s21 + $0x68] sm:$0xff]  ;;  %v223_v25 = vld [vmem:[%s819_s21 + $0x70] sm:$0xff]  ;;  %p592_p8 = scmp.ne.s32.totalorder %s854_s28, %s591_s7  ;;  %s682_s15 = smov [#allocation5]  }
  0x40   : > { %v487_v24 = vpack.c.bf16 %v222_v23, %v221_v22  ;;  %v224_v26 = vld [vmem:[%s819_s21 + $0x78] sm:$0xff]  ;;  %v208_v28 = vld [vmem:[%s902_s1] sm:$0x3]  ;;  %s595_s18 = sshll.u32 %s682_s15, 4  ;;  %s596_s18 = int_to_ptr.vmem [resolvable:$false] %s595_s18 }
  0x41   : > { %v490_v27 = vpack.c.bf16 %v224_v26, %v223_v25  ;;  %p593_p11 = pnand %p592_p8, %p912_p9  ;;  %s597_s19 = scalar_lea.vmem %s596_s18, 64 }
  0x42   : > { %p598_p6 = scmp.lt.s32.totalorder %s854_s28, %s596_s18  ;;  %p599_p13 = scmp.lt.s32.totalorder %s597_s19, %s591_s7 }
  0x43   : > { %p594_p0 = pneg %p593_p11 }
  0x44   : > { %p600_p2 = por %p599_p13, %p598_p6 }
  0x46   : > { %473 = vmatpush3.bf16.xpose.msra.mxu0 %v472_v9  ;;  %p601_p5 = pnand %p600_p2, %p594_p0 }
  0x47   : > { %474 = vmatprep.subr.bf16.mxu0 %v678_v0 }
  0x4e   : > { %476 = vmatpush3.bf16.xpose.msra.mxu0 %v475_v12 }
  0x4f   : > { %477 = vmatprep.subr.bf16.mxu0 %v678_v0 }
  0x56   : > { %479 = vmatpush3.bf16.xpose.msra.mxu0 %v478_v15 }
  0x57   : > { %480 = vmatprep.subr.bf16.mxu0 %v678_v0 }
  0x5e   : > { %482 = vmatpush3.bf16.xpose.msra.mxu0 %v481_v18 }
  0x5f   : > { %483 = vmatprep.subr.bf16.mxu0 %v678_v0 }
  0x66   : > { %485 = vmatpush3.bf16.xpose.msra.mxu0 %v484_v21 }
  0x67   : > { %486 = vmatprep.subr.bf16.mxu0 %v678_v0 }
  0x6e   : > { %488 = vmatpush3.bf16.xpose.msra.mxu0 %v487_v24 }
  0x6f   : > { %489 = vmatprep.subr.bf16.mxu0 %v678_v0 }
  0x76   : > { %491 = vmatpush3.bf16.xpose.msra.mxu0 %v490_v27 }
  0x7d   : > { %466 = vmatmul.mubr.f32.vlgmr.msra.gmra.mrb[0].mxu0 %v208_v28 }
  0xbc   : > { %v229_v29 = vpop.permute.xlu0 %228 }
 0x150   : > { %v297_v30 = vpop.f32.mrb[0].mxu0 }
 0x151   : > { %v298_v31 = vadd.f32 %v297_v30, %v229_v29  ;;  %v467_v32 = vpop.f32.mrb[1].mxu0 }
 0x153   : > { %301 = vst [vmem:[%s206_s23] sm:$0x3] %v298_v31 }
 0x154   : > { %604 = shalt.err (!%p601_p5)
}
 0x155   : > { %s605_s11 = scalar_lea.hbm %s852_s4, 32  ;;  %s609_s6 = scalar_lea.hbm %s904_s3, 64 }
 0x156   : > { %p606_p4 = scmp.ne.s32.totalorder %s852_s4, %s605_s11  ;;  %p610_p12 = scmp.lt.u32.totalorder %s852_s4, %s904_s3 }
 0x157   : > { %p611_p1 = scmp.lt.u32.totalorder %s609_s6, %s605_s11  ;;  %p613_p8 = scmp.lt.u32.totalorder %s605_s11, %s852_s4 }
 0x158   : > { %p607_p7 = pnand %p606_p4, %p912_p9 }
 0x159   : > { %p612_p3 = por %p611_p1, %p610_p12 }
 0x15a   : > { %p608_p10 = pneg %p607_p7 }
 0x15b   : > { %p614_p11 = por %p613_p8, %p612_p3 }
 0x15d   : > { %p615_p0 = pnand %p614_p11, %p608_p10 }
 0x15f   : > { %618 = shalt.err (!%p615_p0)
}
 0x160   : > { %494 = dma.vmem_to_hbm [thread:$0]  (%p912_p9), %s854_s28, 32, %s852_s4, %s303_s5  }
 0x161 PF: > { %s330_s10 = sand.u32 1, %s653_s12   ;;  %p913_p6 = scmp.ne.s32.totalorder %s909_s27, 0 }
 0x162   : > { %p914_p13 = scmp.ge.s32.totalorder %s673_s17, 2  ;;  %s331_s22 = scalar_lea.sflag [#allocation4], %s330_s10 }
 0x164   : > { %p501_p2 = pnand %p914_p13, %p913_p6 }
 0x166   : > { %648 = dma.done.wait (!%p501_p2), %s331_s22, 32  }
 0x167   : > { %650 = vsyncadd (!%p501_p2), %s331_s22, 4294967264  ;;  %s19_s17 = sadd.s32 1, %s673_s17   ;;  %s915_s12 = smov %s657_s13 }
 0x168   : > { %p16_p5 = scmp.ge.s32.totalorder %s19_s17, 4   ;;  %s916_s13 = smov %s661_s14 }
 0x169   : > { %s917_s14 = smov %s759_s26  ;;  %s918_s15 = smov %s669_s16 }
 0x16a   : > { %s919_s16 = smov %s921_s20  ;;  %18 = sbr.rel (!%p16_p5) target bundleno = 6 (0x6), region = 77 }
 0x171   :  { %336 = vsyncpa [#allocation3], 1 }
 0x172   :  { %338 = vsyncpa [#allocation3 + $0x1], 1 }
 0x173   :  { %339 = vsyncpa [#allocation4], 1 }
 0x174   :  { %341 = vsyncpa [#allocation4 + $0x1], 1 }

</bundles_post_ra>
